<compile_context>
chip_gen: v7x
topology: tpu7x:2x2x1
jax: 0.10.0
libtpu: 0.0.40
codegen_flags: <defaults>
</compile_context>

<pallas_src>
import math

import jax
import jax.numpy as jnp
from jax.experimental import pallas as pl
from jax.experimental.pallas import tpu as pltpu  # noqa: F401  (TPU backend)

# ---------------- sizes (small, consistent with MetaACNet.__init__) ----------
L = 8                 # sequence length (number of circuits / LSTM steps)
NUM_NODE = 6
NODE_FTR = 5
EDGE_FTR = 3
A1 = 4
A2 = 5
NUM_TYPE = 3
H = 32                # hidden_dim
DIN = NODE_FTR + EDGE_FTR                       # 8
EXT = 1 + A1 + A2 + NUM_TYPE + 1 + 1            # rewards, a1, a2, types, evs, ts = 15
D_LSTM = H * NUM_NODE + EXT                     # actual concat width (207)
NHEAD = 1 + A1 + A2 + NUM_TYPE + 1              # packed head width = 14

# packed (L, 128) output column layout: [heads14 | hs | cs | pad]
C_V = 0
C_A1 = C_V + 1
C_A2 = C_A1 + A1
C_T = C_A2 + A2
C_EV = C_T + NUM_TYPE
C_H = NHEAD
C_C = C_H + H
PACK_W = 128
PAD_W = PACK_W - (NHEAD + 2 * H)                # 50

# activation slab layout: [circuits_flat (48) | extras (15) | pad (1)]
ACT_W = 64

# weight slab layout (rows; all offsets multiples of 8, lane slices start at 0)
W_LANES = NUM_NODE * H                          # 192
R_WCBD = 0                                      # (48, 192) block-diag cconv weight
R_BC = 48                                       # (1, 192)  tiled cconv bias
R_WIHC = 56                                     # (192, 128) LSTM Wih (node part)
R_WIHE = 248                                    # (15, 128)  LSTM Wih (extras part)
R_BL = 264                                      # (1, 128)   LSTM bias (ih+hh)
R_WHH = 272                                     # (32, 128)  LSTM Whh
R_WHD = 304                                     # (32, 14)   composed head weights
R_BHD = 336                                     # (1, 14)    composed head bias
W_ROWS = 344


# ---------------------------- fused kernel ------------------------------------
def meta_ac_kernel(act_ref, hc0_ref, w_ref, out_ref):
    f32 = jnp.float32

    # --- static slab slices (aligned sublane offsets, lane offsets = 0) -------
    wcbd = w_ref[R_WCBD:R_WCBD + NUM_NODE * DIN, :]           # (48, 192)
    bc = w_ref[R_BC:R_BC + 1, :]                              # (1, 192)
    wihc = w_ref[R_WIHC:R_WIHC + NUM_NODE * H, 0:4 * H]       # (192, 128)
    wihe = w_ref[R_WIHE:R_WIHE + EXT, 0:4 * H]                # (15, 128)
    bl = w_ref[R_BL:R_BL + 1, 0:4 * H]                        # (1, 128)
    whh = w_ref[R_WHH:R_WHH + H, 0:4 * H]                     # (32, 128)
    whd = w_ref[R_WHD:R_WHD + H, 0:NHEAD]                     # (32, 14)
    bhd = w_ref[R_BHD:R_BHD + 1, 0:NHEAD]                     # (1, 14)

    act = act_ref[...]                                        # (8, 64)
    circ = act[:, 0:NUM_NODE * DIN]                           # (8, 48)
    ext = act[:, NUM_NODE * DIN:NUM_NODE * DIN + EXT]         # (8, 15)

    # --- 1. CircuitConv (block-diag, one MXU push) + hoisted input projection -
    # TODO(synk): CircuitConv's definition is not provided upstream; implemented
    # here as a per-node linear projection (din -> hidden) + ReLU.
    xnodes = jnp.maximum(
        jnp.dot(circ, wcbd, preferred_element_type=f32) + bc, 0.0)   # (8, 192)
    gx = (jnp.dot(xnodes, wihc, preferred_element_type=f32)          # K=192
          + jnp.dot(ext, wihe, preferred_element_type=f32)           # K=15
          + bl)                                                      # (8, 128)

    # --- 2. LSTM recurrence, fully unrolled; h/c carried in vregs -------------
    hc0 = hc0_ref[...]                                        # (2, 32)
    h = hc0[0:1, :]
    c = hc0[1:2, :]
    h_rows = []
    c_rows = []
    for t in range(L):
        gates = gx[t:t + 1, :] + jnp.dot(h, whh, preferred_element_type=f32)
        sg = jax.nn.sigmoid(gates)          # one full-vector EUP pass
        tg = jnp.tanh(gates)                # one full-vector EUP pass
        i = sg[:, 0 * H:1 * H]
        f = sg[:, 1 * H:2 * H]
        g = tg[:, 2 * H:3 * H]
        o = sg[:, 3 * H:4 * H]
        c = f * c + i * g
        h = o * jnp.tanh(c)
        h_rows.append(h)
        c_rows.append(c)
    hs = jnp.concatenate(h_rows, axis=0)                      # (8, 32)
    cs = jnp.concatenate(c_rows, axis=0)                      # (8, 32)

    # --- 3. Heads: single composed affine map (32 -> 14) ----------------------
    heads = jnp.dot(hs, whd, preferred_element_type=f32) + bhd        # (8, 14)

    # --- 4. One lane-dense (8, 128) packed output, single unmasked store ------
    pad = jnp.zeros((L, PAD_W), f32)
    out_ref[...] = jnp.concatenate([heads, hs, cs, pad], axis=-1)


# ------------------------- one-time param preparation --------------------------
def prepare_params(p):
    """Build the single packed weight slab (done once, outside the hot path)."""
    f32 = jnp.float32
    # block-diagonal cconv weight: one (8,48)@(48,192) dot replaces 6 per-node dots
    wc_bd = jnp.kron(jnp.eye(NUM_NODE, dtype=f32), p['wc'])           # (48, 192)
    bc_t = jnp.tile(p['bc'], (1, NUM_NODE))                           # (1, 192)

    wih_c = p['wih_t'][:NUM_NODE * H]                                 # (192, 128)
    wih_e = p['wih_t'][NUM_NODE * H:]                                 # (15, 128)

    # compose the purely-linear head cascade into one affine map of hs
    wa2_h, wa2_a1 = p['wa2_t'][:H], p['wa2_t'][H:]
    wt_h, wt_a1, wt_a2 = p['wt_t'][:H], p['wt_t'][H:H + A1], p['wt_t'][H + A1:]
    wev_h = p['wev_t'][:H]
    wev_a1 = p['wev_t'][H:H + A1]
    wev_a2 = p['wev_t'][H + A1:H + A1 + A2]
    wev_ty = p['wev_t'][H + A1 + A2:]

    ew_a1, eb_a1 = p['wa1_t'], p['ba1']
    ew_a2 = wa2_h + ew_a1 @ wa2_a1
    eb_a2 = p['ba2'] + eb_a1 @ wa2_a1
    ew_t = wt_h + ew_a1 @ wt_a1 + ew_a2 @ wt_a2
    eb_t = p['bt'] + eb_a1 @ wt_a1 + eb_a2 @ wt_a2
    ew_ev = wev_h + ew_a1 @ wev_a1 + ew_a2 @ wev_a2 + ew_t @ wev_ty
    eb_ev = p['bev'] + eb_a1 @ wev_a1 + eb_a2 @ wev_a2 + eb_t @ wev_ty

    w_heads = jnp.concatenate([p['wv_t'], ew_a1, ew_a2, ew_t, ew_ev], axis=1)  # (32,14)
    b_heads = jnp.concatenate([p['bv'], eb_a1, eb_a2, eb_t, eb_ev], axis=1)    # (1,14)

    w = jnp.zeros((W_ROWS, W_LANES), f32)
    w = w.at[R_WCBD:R_WCBD + NUM_NODE * DIN, :].set(wc_bd)
    w = w.at[R_BC:R_BC + 1, :].set(bc_t)
    w = w.at[R_WIHC:R_WIHC + NUM_NODE * H, 0:4 * H].set(wih_c)
    w = w.at[R_WIHE:R_WIHE + EXT, 0:4 * H].set(wih_e)
    w = w.at[R_BL:R_BL + 1, 0:4 * H].set(p['b_lstm'])
    w = w.at[R_WHH:R_WHH + H, 0:4 * H].set(p['whh_t'])
    w = w.at[R_WHD:R_WHD + H, 0:NHEAD].set(w_heads)
    w = w.at[R_BHD:R_BHD + 1, 0:NHEAD].set(b_heads)
    return jax.device_put(w)


# ---------------------------- wrapper ------------------------------------------
@jax.jit
def meta_ac_forward(wslab, circuits, prev_rewards, prev_a1s, prev_a2s,
                    prev_types, prev_evs, time_steps, h0, c0):
    # per-call layout prep (tiny XLA ops): one activation slab + one state slab
    circ_flat = circuits.reshape(L, NUM_NODE * DIN)                   # (8, 48)
    ext = jnp.concatenate([prev_rewards, prev_a1s, prev_a2s,
                           prev_types, prev_evs, time_steps], axis=-1)  # (8, 15)
    act = jnp.concatenate(
        [circ_flat, ext,
         jnp.zeros((L, ACT_W - NUM_NODE * DIN - EXT), jnp.float32)], axis=-1)
    hc0 = jnp.concatenate([h0, c0], axis=0)                           # (2, 32)

    packed = pl.pallas_call(
        meta_ac_kernel,
        out_shape=jax.ShapeDtypeStruct((L, PACK_W), jnp.float32),
    )(act, hc0, wslab)

    values = packed[:, C_V:C_V + 1]
    a1s = packed[:, C_A1:C_A1 + A1]
    a2s = packed[:, C_A2:C_A2 + A2]
    types = packed[:, C_T:C_T + NUM_TYPE]
    evs = packed[:, C_EV:C_EV + 1]
    hs = packed[:, C_H:C_H + H]
    cs = packed[:, C_C:C_C + H]
    hn = hs[L - 1:L]
    cn = cs[L - 1:L]
    # flattened argmax (first occurrence), matches th.argmax; fused by XLA.
    arg_t = jnp.argmax(types)
    return values, (a1s, a2s, arg_t, evs), (hn, cn), types, hs


# ------------------------- params & reference ---------------------------------
def xavier_t(key, fan_in, fan_out):
    # PyTorch Linear weight is (out, in); we store W^T = (in, out).
    lim = math.sqrt(6.0 / (fan_in + fan_out))
    return jax.random.uniform(key, (fan_in, fan_out), jnp.float32, -lim, lim)


def make_params(key):
    ks = jax.random.split(key, 10)
    k_lstm = 1.0 / math.sqrt(H)
    return dict(
        wc=xavier_t(ks[0], DIN, H),
        bc=jnp.zeros((1, H), jnp.float32),
        wih_t=jax.random.uniform(ks[1], (D_LSTM, 4 * H), jnp.float32,
                                 -k_lstm, k_lstm),
        whh_t=jax.random.uniform(ks[2], (H, 4 * H), jnp.float32,
                                 -k_lstm, k_lstm),
        b_lstm=jax.random.uniform(ks[3], (1, 4 * H), jnp.float32,
                                  -k_lstm, k_lstm)
               + jax.random.uniform(ks[4], (1, 4 * H), jnp.float32,
                                    -k_lstm, k_lstm),
        wv_t=xavier_t(ks[5], H, 1), bv=jnp.zeros((1, 1), jnp.float32),
        wa1_t=xavier_t(ks[6], H, A1), ba1=jnp.zeros((1, A1), jnp.float32),
        wa2_t=xavier_t(ks[7], H + A1, A2), ba2=jnp.zeros((1, A2), jnp.float32),
        wt_t=xavier_t(ks[8], H + A1 + A2, NUM_TYPE),
        bt=jnp.zeros((1, NUM_TYPE), jnp.float32),
        wev_t=xavier_t(ks[9], H + A1 + A2 + NUM_TYPE, 1),
        bev=jnp.zeros((1, 1), jnp.float32),
    )


def reference_forward(p, circuits, prev_rewards, prev_a1s, prev_a2s,
                      prev_types, prev_evs, time_steps, h0, c0):
    feats = circuits.reshape(L * NUM_NODE, DIN)
    node_h = jnp.maximum(feats @ p['wc'] + p['bc'], 0.0)
    x = node_h.reshape(L, NUM_NODE * H)
    x = jnp.concatenate([x, prev_rewards, prev_a1s, prev_a2s,
                         prev_types, prev_evs, time_steps], axis=-1)
    h, c = h0, c0
    hs = []
    for t in range(L):
        gates = x[t:t + 1] @ p['wih_t'] + h @ p['whh_t'] + p['b_lstm']
        i = jax.nn.sigmoid(gates[:, 0 * H:1 * H])
        f = jax.nn.sigmoid(gates[:, 1 * H:2 * H])
        g = jnp.tanh(gates[:, 2 * H:3 * H])
        o = jax.nn.sigmoid(gates[:, 3 * H:4 * H])
        c = f * c + i * g
        h = o * jnp.tanh(c)
        hs.append(h)
    hs = jnp.concatenate(hs, axis=0)
    values = hs @ p['wv_t'] + p['bv']
    a1s = hs @ p['wa1_t'] + p['ba1']
    x2 = jnp.concatenate([hs, a1s], -1)
    a2s = x2 @ p['wa2_t'] + p['ba2']
    x3 = jnp.concatenate([x2, a2s], -1)
    types = x3 @ p['wt_t'] + p['bt']
    x4 = jnp.concatenate([x3, types], -1)
    evs = x4 @ p['wev_t'] + p['bev']
    return values, a1s, a2s, types, jnp.argmax(types), evs, h, c


# ------------------------------- main ------------------------------------------
if __name__ == "__main__":
    key = jax.random.PRNGKey(0)
    kp, kd = jax.random.split(key)
    params = make_params(kp)
    wslab = prepare_params(params)     # one-time packing (outside the hot path)

    kds = jax.random.split(kd, 7)
    circuits = jax.random.normal(kds[0], (L, NUM_NODE, DIN), jnp.float32)
    prev_rewards = jax.random.normal(kds[1], (L, 1), jnp.float32)
    prev_a1s = jax.random.normal(kds[2], (L, A1), jnp.float32)
    prev_a2s = jax.random.normal(kds[3], (L, A2), jnp.float32)
    prev_types = jax.random.normal(kds[4], (L, NUM_TYPE), jnp.float32)
    prev_evs = jax.random.normal(kds[5], (L, 1), jnp.float32)
    time_steps = jax.random.normal(kds[6], (L, 1), jnp.float32)
    h0 = jnp.zeros((1, H), jnp.float32)
    c0 = jnp.zeros((1, H), jnp.float32)

    out = meta_ac_forward(wslab, circuits, prev_rewards, prev_a1s, prev_a2s,
                          prev_types, prev_evs, time_steps, h0, c0)
    out = jax.block_until_ready(out)
    values, (a1s, a2s, arg_t, evs), (hn, cn), types, hs = out

    # cross-check against a pure-JAX reference
    r_values, r_a1s, r_a2s, r_types, r_arg, r_evs, r_hn, r_cn = \
        reference_forward(params, circuits, prev_rewards, prev_a1s, prev_a2s,
                          prev_types, prev_evs, time_steps, h0, c0)

    def ok(a, b):
        return bool(jnp.allclose(a, b, atol=1e-4, rtol=1e-4))

    assert ok(values, r_values) and ok(a1s, r_a1s) and ok(a2s, r_a2s)
    assert ok(types, r_types) and ok(evs, r_evs)
    assert ok(hn, r_hn) and ok(cn, r_cn)
    assert int(arg_t) == int(r_arg)

    print("KERNEL_OK")
</pallas_src>

<mosaic_0001>
module attributes {stable_mosaic.version = 11 : i64} {
  func.func @meta_ac_kernel(%arg0: memref<8x64xf32, #tpu.memory_space<vmem>>, %arg1: memref<2x32xf32, #tpu.memory_space<vmem>>, %arg2: memref<344x192xf32, #tpu.memory_space<vmem>>, %arg3: memref<8x128xf32, #tpu.memory_space<vmem>>) attributes {dimension_semantics = [], scalar_prefetch = 0 : i64, scratch_operands = 0 : i64, tpu.core_type = #tpu.core_type<tc>} {
    %c0 = arith.constant 0 : index
    %c0_0 = arith.constant 0 : index
    %0 = vector.load %arg2[%c0, %c0_0] : memref<344x192xf32, #tpu.memory_space<vmem>>, vector<48x192xf32>
    %c48 = arith.constant 48 : index
    %c0_1 = arith.constant 0 : index
    %1 = vector.load %arg2[%c48, %c0_1] : memref<344x192xf32, #tpu.memory_space<vmem>>, vector<1x192xf32>
    %c56 = arith.constant 56 : index
    %c0_2 = arith.constant 0 : index
    %2 = vector.load %arg2[%c56, %c0_2] : memref<344x192xf32, #tpu.memory_space<vmem>>, vector<192x128xf32>
    %c248 = arith.constant 248 : index
    %c0_3 = arith.constant 0 : index
    %3 = vector.load %arg2[%c248, %c0_3] : memref<344x192xf32, #tpu.memory_space<vmem>>, vector<15x128xf32>
    %c264 = arith.constant 264 : index
    %c0_4 = arith.constant 0 : index
    %4 = vector.load %arg2[%c264, %c0_4] : memref<344x192xf32, #tpu.memory_space<vmem>>, vector<1x128xf32>
    %c272 = arith.constant 272 : index
    %c0_5 = arith.constant 0 : index
    %5 = vector.load %arg2[%c272, %c0_5] : memref<344x192xf32, #tpu.memory_space<vmem>>, vector<32x128xf32>
    %c304 = arith.constant 304 : index
    %c0_6 = arith.constant 0 : index
    %6 = vector.load %arg2[%c304, %c0_6] : memref<344x192xf32, #tpu.memory_space<vmem>>, vector<32x14xf32>
    %c336 = arith.constant 336 : index
    %c0_7 = arith.constant 0 : index
    %7 = vector.load %arg2[%c336, %c0_7] : memref<344x192xf32, #tpu.memory_space<vmem>>, vector<1x14xf32>
    %c0_8 = arith.constant 0 : index
    %c0_9 = arith.constant 0 : index
    %8 = vector.load %arg0[%c0_8, %c0_9] : memref<8x64xf32, #tpu.memory_space<vmem>>, vector<8x64xf32>
    %9 = vector.extract_strided_slice %8 {offsets = [0, 0], sizes = [8, 48], strides = [1, 1]} : vector<8x64xf32> to vector<8x48xf32>
    %10 = vector.extract_strided_slice %8 {offsets = [0, 48], sizes = [8, 15], strides = [1, 1]} : vector<8x64xf32> to vector<8x15xf32>
    %cst = arith.constant dense<0.000000e+00> : vector<8x192xf32>
    %11 = tpu.matmul %9, %0, %cst {dimension_numbers = #tpu.dot_dimension_numbers<[1], [0], [0], [1], [0, 0, 1, 1], [], []>} : vector<8x48xf32>, vector<48x192xf32>, vector<8x192xf32> -> vector<8x192xf32>
    %12 = vector.broadcast %1 : vector<1x192xf32> to vector<8x192xf32>
    %13 = arith.addf %11, %12 : vector<8x192xf32>
    %cst_10 = arith.constant 0.000000e+00 : f32
    %14 = vector.broadcast %cst_10 : f32 to vector<8x192xf32>
    %15 = arith.maximumf %13, %14 : vector<8x192xf32>
    %cst_11 = arith.constant dense<0.000000e+00> : vector<8x128xf32>
    %16 = tpu.matmul %15, %2, %cst_11 {dimension_numbers = #tpu.dot_dimension_numbers<[1], [0], [0], [1], [0, 0, 1, 1], [], []>} : vector<8x192xf32>, vector<192x128xf32>, vector<8x128xf32> -> vector<8x128xf32>
    %cst_12 = arith.constant dense<0.000000e+00> : vector<8x128xf32>
    %17 = tpu.matmul %10, %3, %cst_12 {dimension_numbers = #tpu.dot_dimension_numbers<[1], [0], [0], [1], [0, 0, 1, 1], [], []>} : vector<8x15xf32>, vector<15x128xf32>, vector<8x128xf32> -> vector<8x128xf32>
    %18 = arith.addf %16, %17 : vector<8x128xf32>
    %19 = vector.broadcast %4 : vector<1x128xf32> to vector<8x128xf32>
    %20 = arith.addf %18, %19 : vector<8x128xf32>
    %c0_13 = arith.constant 0 : index
    %c0_14 = arith.constant 0 : index
    %21 = vector.load %arg1[%c0_13, %c0_14] : memref<2x32xf32, #tpu.memory_space<vmem>>, vector<2x32xf32>
    %22 = vector.extract_strided_slice %21 {offsets = [0, 0], sizes = [1, 32], strides = [1, 1]} : vector<2x32xf32> to vector<1x32xf32>
    %23 = vector.extract_strided_slice %21 {offsets = [1, 0], sizes = [1, 32], strides = [1, 1]} : vector<2x32xf32> to vector<1x32xf32>
    %24 = vector.extract_strided_slice %20 {offsets = [0, 0], sizes = [1, 128], strides = [1, 1]} : vector<8x128xf32> to vector<1x128xf32>
    %cst_15 = arith.constant dense<0.000000e+00> : vector<1x128xf32>
    %25 = tpu.matmul %22, %5, %cst_15 {dimension_numbers = #tpu.dot_dimension_numbers<[1], [0], [0], [1], [0, 0, 1, 1], [], []>} : vector<1x32xf32>, vector<32x128xf32>, vector<1x128xf32> -> vector<1x128xf32>
    %26 = arith.addf %24, %25 : vector<1x128xf32>
    %27 = arith.negf %26 : vector<1x128xf32>
    %28 = math.exp %27 : vector<1x128xf32>
    %cst_16 = arith.constant 1.000000e+00 : f32
    %29 = vector.broadcast %cst_16 : f32 to vector<1x128xf32>
    %30 = arith.addf %29, %28 : vector<1x128xf32>
    %31 = arith.divf %29, %30 : vector<1x128xf32>
    %32 = math.tanh %26 : vector<1x128xf32>
    %33 = vector.extract_strided_slice %31 {offsets = [0, 0], sizes = [1, 32], strides = [1, 1]} : vector<1x128xf32> to vector<1x32xf32>
    %34 = vector.extract_strided_slice %31 {offsets = [0, 32], sizes = [1, 32], strides = [1, 1]} : vector<1x128xf32> to vector<1x32xf32>
    %35 = vector.extract_strided_slice %32 {offsets = [0, 64], sizes = [1, 32], strides = [1, 1]} : vector<1x128xf32> to vector<1x32xf32>
    %36 = vector.extract_strided_slice %31 {offsets = [0, 96], sizes = [1, 32], strides = [1, 1]} : vector<1x128xf32> to vector<1x32xf32>
    %37 = arith.mulf %34, %23 : vector<1x32xf32>
    %38 = arith.mulf %33, %35 : vector<1x32xf32>
    %39 = arith.addf %37, %38 : vector<1x32xf32>
    %40 = math.tanh %39 : vector<1x32xf32>
    %41 = arith.mulf %36, %40 : vector<1x32xf32>
    %42 = vector.extract_strided_slice %20 {offsets = [1, 0], sizes = [1, 128], strides = [1, 1]} : vector<8x128xf32> to vector<1x128xf32>
    %cst_17 = arith.constant dense<0.000000e+00> : vector<1x128xf32>
    %43 = tpu.matmul %41, %5, %cst_17 {dimension_numbers = #tpu.dot_dimension_numbers<[1], [0], [0], [1], [0, 0, 1, 1], [], []>} : vector<1x32xf32>, vector<32x128xf32>, vector<1x128xf32> -> vector<1x128xf32>
    %44 = arith.addf %42, %43 : vector<1x128xf32>
    %45 = arith.negf %44 : vector<1x128xf32>
    %46 = math.exp %45 : vector<1x128xf32>
    %cst_18 = arith.constant 1.000000e+00 : f32
    %47 = vector.broadcast %cst_18 : f32 to vector<1x128xf32>
    %48 = arith.addf %47, %46 : vector<1x128xf32>
    %49 = arith.divf %47, %48 : vector<1x128xf32>
    %50 = math.tanh %44 : vector<1x128xf32>
    %51 = vector.extract_strided_slice %49 {offsets = [0, 0], sizes = [1, 32], strides = [1, 1]} : vector<1x128xf32> to vector<1x32xf32>
    %52 = vector.extract_strided_slice %49 {offsets = [0, 32], sizes = [1, 32], strides = [1, 1]} : vector<1x128xf32> to vector<1x32xf32>
    %53 = vector.extract_strided_slice %50 {offsets = [0, 64], sizes = [1, 32], strides = [1, 1]} : vector<1x128xf32> to vector<1x32xf32>
    %54 = vector.extract_strided_slice %49 {offsets = [0, 96], sizes = [1, 32], strides = [1, 1]} : vector<1x128xf32> to vector<1x32xf32>
    %55 = arith.mulf %52, %39 : vector<1x32xf32>
    %56 = arith.mulf %51, %53 : vector<1x32xf32>
    %57 = arith.addf %55, %56 : vector<1x32xf32>
    %58 = math.tanh %57 : vector<1x32xf32>
    %59 = arith.mulf %54, %58 : vector<1x32xf32>
    %60 = vector.extract_strided_slice %20 {offsets = [2, 0], sizes = [1, 128], strides = [1, 1]} : vector<8x128xf32> to vector<1x128xf32>
    %cst_19 = arith.constant dense<0.000000e+00> : vector<1x128xf32>
    %61 = tpu.matmul %59, %5, %cst_19 {dimension_numbers = #tpu.dot_dimension_numbers<[1], [0], [0], [1], [0, 0, 1, 1], [], []>} : vector<1x32xf32>, vector<32x128xf32>, vector<1x128xf32> -> vector<1x128xf32>
    %62 = arith.addf %60, %61 : vector<1x128xf32>
    %63 = arith.negf %62 : vector<1x128xf32>
    %64 = math.exp %63 : vector<1x128xf32>
    %cst_20 = arith.constant 1.000000e+00 : f32
    %65 = vector.broadcast %cst_20 : f32 to vector<1x128xf32>
    %66 = arith.addf %65, %64 : vector<1x128xf32>
    %67 = arith.divf %65, %66 : vector<1x128xf32>
    %68 = math.tanh %62 : vector<1x128xf32>
    %69 = vector.extract_strided_slice %67 {offsets = [0, 0], sizes = [1, 32], strides = [1, 1]} : vector<1x128xf32> to vector<1x32xf32>
    %70 = vector.extract_strided_slice %67 {offsets = [0, 32], sizes = [1, 32], strides = [1, 1]} : vector<1x128xf32> to vector<1x32xf32>
    %71 = vector.extract_strided_slice %68 {offsets = [0, 64], sizes = [1, 32], strides = [1, 1]} : vector<1x128xf32> to vector<1x32xf32>
    %72 = vector.extract_strided_slice %67 {offsets = [0, 96], sizes = [1, 32], strides = [1, 1]} : vector<1x128xf32> to vector<1x32xf32>
    %73 = arith.mulf %70, %57 : vector<1x32xf32>
    %74 = arith.mulf %69, %71 : vector<1x32xf32>
    %75 = arith.addf %73, %74 : vector<1x32xf32>
    %76 = math.tanh %75 : vector<1x32xf32>
    %77 = arith.mulf %72, %76 : vector<1x32xf32>
    %78 = vector.extract_strided_slice %20 {offsets = [3, 0], sizes = [1, 128], strides = [1, 1]} : vector<8x128xf32> to vector<1x128xf32>
    %cst_21 = arith.constant dense<0.000000e+00> : vector<1x128xf32>
    %79 = tpu.matmul %77, %5, %cst_21 {dimension_numbers = #tpu.dot_dimension_numbers<[1], [0], [0], [1], [0, 0, 1, 1], [], []>} : vector<1x32xf32>, vector<32x128xf32>, vector<1x128xf32> -> vector<1x128xf32>
    %80 = arith.addf %78, %79 : vector<1x128xf32>
    %81 = arith.negf %80 : vector<1x128xf32>
    %82 = math.exp %81 : vector<1x128xf32>
    %cst_22 = arith.constant 1.000000e+00 : f32
    %83 = vector.broadcast %cst_22 : f32 to vector<1x128xf32>
    %84 = arith.addf %83, %82 : vector<1x128xf32>
    %85 = arith.divf %83, %84 : vector<1x128xf32>
    %86 = math.tanh %80 : vector<1x128xf32>
    %87 = vector.extract_strided_slice %85 {offsets = [0, 0], sizes = [1, 32], strides = [1, 1]} : vector<1x128xf32> to vector<1x32xf32>
    %88 = vector.extract_strided_slice %85 {offsets = [0, 32], sizes = [1, 32], strides = [1, 1]} : vector<1x128xf32> to vector<1x32xf32>
    %89 = vector.extract_strided_slice %86 {offsets = [0, 64], sizes = [1, 32], strides = [1, 1]} : vector<1x128xf32> to vector<1x32xf32>
    %90 = vector.extract_strided_slice %85 {offsets = [0, 96], sizes = [1, 32], strides = [1, 1]} : vector<1x128xf32> to vector<1x32xf32>
    %91 = arith.mulf %88, %75 : vector<1x32xf32>
    %92 = arith.mulf %87, %89 : vector<1x32xf32>
    %93 = arith.addf %91, %92 : vector<1x32xf32>
    %94 = math.tanh %93 : vector<1x32xf32>
    %95 = arith.mulf %90, %94 : vector<1x32xf32>
    %96 = vector.extract_strided_slice %20 {offsets = [4, 0], sizes = [1, 128], strides = [1, 1]} : vector<8x128xf32> to vector<1x128xf32>
    %cst_23 = arith.constant dense<0.000000e+00> : vector<1x128xf32>
    %97 = tpu.matmul %95, %5, %cst_23 {dimension_numbers = #tpu.dot_dimension_numbers<[1], [0], [0], [1], [0, 0, 1, 1], [], []>} : vector<1x32xf32>, vector<32x128xf32>, vector<1x128xf32> -> vector<1x128xf32>
    %98 = arith.addf %96, %97 : vector<1x128xf32>
    %99 = arith.negf %98 : vector<1x128xf32>
    %100 = math.exp %99 : vector<1x128xf32>
    %cst_24 = arith.constant 1.000000e+00 : f32
    %101 = vector.broadcast %cst_24 : f32 to vector<1x128xf32>
    %102 = arith.addf %101, %100 : vector<1x128xf32>
    %103 = arith.divf %101, %102 : vector<1x128xf32>
    %104 = math.tanh %98 : vector<1x128xf32>
    %105 = vector.extract_strided_slice %103 {offsets = [0, 0], sizes = [1, 32], strides = [1, 1]} : vector<1x128xf32> to vector<1x32xf32>
    %106 = vector.extract_strided_slice %103 {offsets = [0, 32], sizes = [1, 32], strides = [1, 1]} : vector<1x128xf32> to vector<1x32xf32>
    %107 = vector.extract_strided_slice %104 {offsets = [0, 64], sizes = [1, 32], strides = [1, 1]} : vector<1x128xf32> to vector<1x32xf32>
    %108 = vector.extract_strided_slice %103 {offsets = [0, 96], sizes = [1, 32], strides = [1, 1]} : vector<1x128xf32> to vector<1x32xf32>
    %109 = arith.mulf %106, %93 : vector<1x32xf32>
    %110 = arith.mulf %105, %107 : vector<1x32xf32>
    %111 = arith.addf %109, %110 : vector<1x32xf32>
    %112 = math.tanh %111 : vector<1x32xf32>
    %113 = arith.mulf %108, %112 : vector<1x32xf32>
    %114 = vector.extract_strided_slice %20 {offsets = [5, 0], sizes = [1, 128], strides = [1, 1]} : vector<8x128xf32> to vector<1x128xf32>
    %cst_25 = arith.constant dense<0.000000e+00> : vector<1x128xf32>
    %115 = tpu.matmul %113, %5, %cst_25 {dimension_numbers = #tpu.dot_dimension_numbers<[1], [0], [0], [1], [0, 0, 1, 1], [], []>} : vector<1x32xf32>, vector<32x128xf32>, vector<1x128xf32> -> vector<1x128xf32>
    %116 = arith.addf %114, %115 : vector<1x128xf32>
    %117 = arith.negf %116 : vector<1x128xf32>
    %118 = math.exp %117 : vector<1x128xf32>
    %cst_26 = arith.constant 1.000000e+00 : f32
    %119 = vector.broadcast %cst_26 : f32 to vector<1x128xf32>
    %120 = arith.addf %119, %118 : vector<1x128xf32>
    %121 = arith.divf %119, %120 : vector<1x128xf32>
    %122 = math.tanh %116 : vector<1x128xf32>
    %123 = vector.extract_strided_slice %121 {offsets = [0, 0], sizes = [1, 32], strides = [1, 1]} : vector<1x128xf32> to vector<1x32xf32>
    %124 = vector.extract_strided_slice %121 {offsets = [0, 32], sizes = [1, 32], strides = [1, 1]} : vector<1x128xf32> to vector<1x32xf32>
    %125 = vector.extract_strided_slice %122 {offsets = [0, 64], sizes = [1, 32], strides = [1, 1]} : vector<1x128xf32> to vector<1x32xf32>
    %126 = vector.extract_strided_slice %121 {offsets = [0, 96], sizes = [1, 32], strides = [1, 1]} : vector<1x128xf32> to vector<1x32xf32>
    %127 = arith.mulf %124, %111 : vector<1x32xf32>
    %128 = arith.mulf %123, %125 : vector<1x32xf32>
    %129 = arith.addf %127, %128 : vector<1x32xf32>
    %130 = math.tanh %129 : vector<1x32xf32>
    %131 = arith.mulf %126, %130 : vector<1x32xf32>
    %132 = vector.extract_strided_slice %20 {offsets = [6, 0], sizes = [1, 128], strides = [1, 1]} : vector<8x128xf32> to vector<1x128xf32>
    %cst_27 = arith.constant dense<0.000000e+00> : vector<1x128xf32>
    %133 = tpu.matmul %131, %5, %cst_27 {dimension_numbers = #tpu.dot_dimension_numbers<[1], [0], [0], [1], [0, 0, 1, 1], [], []>} : vector<1x32xf32>, vector<32x128xf32>, vector<1x128xf32> -> vector<1x128xf32>
    %134 = arith.addf %132, %133 : vector<1x128xf32>
    %135 = arith.negf %134 : vector<1x128xf32>
    %136 = math.exp %135 : vector<1x128xf32>
    %cst_28 = arith.constant 1.000000e+00 : f32
    %137 = vector.broadcast %cst_28 : f32 to vector<1x128xf32>
    %138 = arith.addf %137, %136 : vector<1x128xf32>
    %139 = arith.divf %137, %138 : vector<1x128xf32>
    %140 = math.tanh %134 : vector<1x128xf32>
    %141 = vector.extract_strided_slice %139 {offsets = [0, 0], sizes = [1, 32], strides = [1, 1]} : vector<1x128xf32> to vector<1x32xf32>
    %142 = vector.extract_strided_slice %139 {offsets = [0, 32], sizes = [1, 32], strides = [1, 1]} : vector<1x128xf32> to vector<1x32xf32>
    %143 = vector.extract_strided_slice %140 {offsets = [0, 64], sizes = [1, 32], strides = [1, 1]} : vector<1x128xf32> to vector<1x32xf32>
    %144 = vector.extract_strided_slice %139 {offsets = [0, 96], sizes = [1, 32], strides = [1, 1]} : vector<1x128xf32> to vector<1x32xf32>
    %145 = arith.mulf %142, %129 : vector<1x32xf32>
    %146 = arith.mulf %141, %143 : vector<1x32xf32>
    %147 = arith.addf %145, %146 : vector<1x32xf32>
    %148 = math.tanh %147 : vector<1x32xf32>
    %149 = arith.mulf %144, %148 : vector<1x32xf32>
    %150 = vector.extract_strided_slice %20 {offsets = [7, 0], sizes = [1, 128], strides = [1, 1]} : vector<8x128xf32> to vector<1x128xf32>
    %cst_29 = arith.constant dense<0.000000e+00> : vector<1x128xf32>
    %151 = tpu.matmul %149, %5, %cst_29 {dimension_numbers = #tpu.dot_dimension_numbers<[1], [0], [0], [1], [0, 0, 1, 1], [], []>} : vector<1x32xf32>, vector<32x128xf32>, vector<1x128xf32> -> vector<1x128xf32>
    %152 = arith.addf %150, %151 : vector<1x128xf32>
    %153 = arith.negf %152 : vector<1x128xf32>
    %154 = math.exp %153 : vector<1x128xf32>
    %cst_30 = arith.constant 1.000000e+00 : f32
    %155 = vector.broadcast %cst_30 : f32 to vector<1x128xf32>
    %156 = arith.addf %155, %154 : vector<1x128xf32>
    %157 = arith.divf %155, %156 : vector<1x128xf32>
    %158 = math.tanh %152 : vector<1x128xf32>
    %159 = vector.extract_strided_slice %157 {offsets = [0, 0], sizes = [1, 32], strides = [1, 1]} : vector<1x128xf32> to vector<1x32xf32>
    %160 = vector.extract_strided_slice %157 {offsets = [0, 32], sizes = [1, 32], strides = [1, 1]} : vector<1x128xf32> to vector<1x32xf32>
    %161 = vector.extract_strided_slice %158 {offsets = [0, 64], sizes = [1, 32], strides = [1, 1]} : vector<1x128xf32> to vector<1x32xf32>
    %162 = vector.extract_strided_slice %157 {offsets = [0, 96], sizes = [1, 32], strides = [1, 1]} : vector<1x128xf32> to vector<1x32xf32>
    %163 = arith.mulf %160, %147 : vector<1x32xf32>
    %164 = arith.mulf %159, %161 : vector<1x32xf32>
    %165 = arith.addf %163, %164 : vector<1x32xf32>
    %166 = math.tanh %165 : vector<1x32xf32>
    %167 = arith.mulf %162, %166 : vector<1x32xf32>
    %168 = tpu.concatenate %41, %59, %77, %95, %113, %131, %149, %167 in 0 : vector<1x32xf32>, vector<1x32xf32>, vector<1x32xf32>, vector<1x32xf32>, vector<1x32xf32>, vector<1x32xf32>, vector<1x32xf32>, vector<1x32xf32> -> vector<8x32xf32>
    %169 = tpu.concatenate %39, %57, %75, %93, %111, %129, %147, %165 in 0 : vector<1x32xf32>, vector<1x32xf32>, vector<1x32xf32>, vector<1x32xf32>, vector<1x32xf32>, vector<1x32xf32>, vector<1x32xf32>, vector<1x32xf32> -> vector<8x32xf32>
    %cst_31 = arith.constant dense<0.000000e+00> : vector<8x14xf32>
    %170 = tpu.matmul %168, %6, %cst_31 {dimension_numbers = #tpu.dot_dimension_numbers<[1], [0], [0], [1], [0, 0, 1, 1], [], []>} : vector<8x32xf32>, vector<32x14xf32>, vector<8x14xf32> -> vector<8x14xf32>
    %171 = vector.broadcast %7 : vector<1x14xf32> to vector<8x14xf32>
    %172 = arith.addf %170, %171 : vector<8x14xf32>
    %cst_32 = arith.constant 0.000000e+00 : f32
    %173 = vector.broadcast %cst_32 : f32 to vector<8x50xf32>
    %174 = tpu.concatenate %172, %168, %169, %173 in 1 : vector<8x14xf32>, vector<8x32xf32>, vector<8x32xf32>, vector<8x50xf32> -> vector<8x128xf32>
    %c0_33 = arith.constant 0 : index
    %c0_34 = arith.constant 0 : index
    %175 = vector.load %arg3[%c0_33, %c0_34] : memref<8x128xf32, #tpu.memory_space<vmem>>, vector<8x128xf32>
    tpu.vector_store %arg3[%c0_33, %c0_34], %174 {strides = array<i32>} : memref<8x128xf32, #tpu.memory_space<vmem>>, vector<8x128xf32>,
    return
  }
}

</mosaic_0001>

<bundles_post_ra>
// kernel: meta_ac_forward.1
= control target key start
LH: loop header
LB: loop body
LE: loop exit
PB: predicated region body
PF: predicated region fallthrough
CT: control target
= control target key end

     0   :  { %v1627_v3 = vmov 0.0   ;;  %v1628_v4 = vmov 0.0|0.0   ;;  %vm1629_vm0 = vmmov 0   ;;  %vm158_vm1 = vcmask 1046528   ;;  %s1630_s15 = smov 80   ;;  %s1632_s25 = smov 32   ;;  %s1948_s2 = inlined_call_operand.vmem [shape: f32[344,192], index: 2, kind: input, shape index: {}]   ;;  %s1949_s0 = inlined_call_operand.vmem [shape: f32[8,64], index: 0, kind: input, shape index: {}]   ;;  %s1950_s1 = inlined_call_operand.vmem [shape: f32[2,32], index: 1, kind: input, shape index: {}]   ;;  %s1951_s3 = inlined_call_operand.vmem [shape: f32[8,128], index: 3, kind: output, shape index: {}]  }
   0x1   :  { %v15_v0 = vld [vmem:[%s1948_s2 + $0x8] sm:$0xff]  ;;  %v17_v1 = vld [vmem:[%s1948_s2 + $0x18] sm:$0xff]  ;;  %v14_v2 = vld [vmem:[%s1948_s2] sm:$0xff]  ;;  %144 = vmatprep.mubr.f32.mxu0 %v1627_v3  ;;  %1460 = vmatprep.subr.bf16.mxu1 %v1628_v4  ;;  %vm1631_vm2 = vmmov 1   ;;  %vm76_vm4 = vcmask 392192   ;;  %vm308_vm5 = vcmask 261120  }
   0x2   :  { %v1448_v5 = vpack.c.bf16 %v17_v1, %v15_v0  ;;  %v16_v6 = vld [vmem:[%s1948_s2 + $0x10] sm:$0xff]  ;;  %v19_v7 = vld [vmem:[%s1948_s2 + $0x28] sm:$0xff]  ;;  %v21_v8 = vld [vmem:[%s1948_s2 + $0x38] sm:$0xff]  ;;  %1346 = vmatprep.mubr.msk.f32.mxu1 %vm1629_vm0, %v1627_v3  ;;  %vm155_vm6 = vcmask 121856   ;;  %vm232_vm7 = vcmask 523264   ;;  %s1633_s21 = smov 64  }
   0x3   :  { %v1450_v9 = vpack.c.bf16 %v16_v6, %v14_v2  ;;  %v1452_v10 = vpack.c.bf16 %v21_v8, %v19_v7  ;;  %v18_v11 = vld [vmem:[%s1948_s2 + $0x20] sm:$0xff]  ;;  %v20_v12 = vld [vmem:[%s1948_s2 + $0x30] sm:$0xff]  ;;  %v23_v13 = vld [vmem:[%s1948_s2 + $0x48] sm:$0xff]  ;;  %v66_v7 = vlaneseq  ;;  %vm1159_vm8 = vcmask 1040384   ;;  %s1634_s30 = smov 46   ;;  %s1635_s4 = smov 14  }
   0x4   :  { %1449 = vmatprep.subr.bf16.mxu0 %v1448_v5  ;;  %v25_v14 = vld [vmem:[%s1948_s2 + $0x58] sm:$0xff]  ;;  %v1454_v15 = vpack.c.bf16 %v20_v12, %v18_v11  ;;  %v64_v16 = vld [vmem:[%s1949_s0] sm:$0xff]  ;;  %v52_v17 = vld [vmem:[%s1948_s2 + $0x1f0] sm:$0xff]  ;;  %vm1161_vm9 = vcmask 1041408   ;;  %vm1163_vm10 = vcmask 1042432   ;;  %vm1165_vm11 = vcmask 1043456  }
   0x5   :  { %1451 = vmatpush1.bf16.msra.mxu0 %v1450_v9  ;;  %v53_v18 = vld [vmem:[%s1948_s2 + $0x200] sm:$0x7f]  ;;  %v1456_v19 = vpack.c.bf16 %v25_v14, %v23_v13  ;;  %v24_v21 = vld [vmem:[%s1948_s2 + $0x50] sm:$0xff]  ;;  %153 = vrot.lane.b32.xlu0 %v64_v16, %s1630_s15  ;;  %vm1462_vm3 = vmpackc.low %vm158_vm1, %vm1631_vm2  ;;  %v67_v8 = vshrl.u32 %v66_v7, 7  ;;  %vm1167_vm12 = vcmask 1044480   ;;  %vm1169_vm13 = vcmask 1045504  }
   0x6   :  { %1453 = vmatprep.subr.bf16.mxu0 %v1452_v10  ;;  %v22_v20 = vld [vmem:[%s1948_s2 + $0x40] sm:$0xff]  ;;  %v1461_v22 = vpack.c.bf16 %v53_v18, %v52_v17  ;;  %v56_v25 = vld [vmem:[%s1948_s2 + $0x230] sm:$0xff]  ;;  %vm1261_vm14 = vcmask 113664   ;;  %vm1263_vm15 = vcmask 375808  }
   0x7   :  { %v1458_v23 = vpack.c.bf16 %v24_v21, %v22_v20  ;;  %v55_v24 = vld [vmem:[%s1948_s2 + $0x220] sm:$0xff]  ;;  %v58_v28 = vld [vmem:[%s1948_s2 + $0x250] sm:$0xff]  ;;  %v68_v9 = vsub.s32 0, %v67_v8  ;;  %v72_v11 = vsub.s32 1, %v67_v8 }
   0x8   :  { %1463 = vmatpush3.bf16.msk.msra.mxu1 %vm1462_vm3, %v1461_v22  ;;  %v1716_v26 = vpack.c.bf16 %v56_v25, %v55_v24  ;;  %v57_v27 = vld [vmem:[%s1948_s2 + $0x240] sm:$0xff]  ;;  %v28_v32 = vld [vmem:[%s1948_s2 + $0x70] sm:$0xff] }
   0x9   :  { %1455 = vmatpush1.bf16.msra.mxu0 %v1454_v15  ;;  %1464 = vmatprep.subr.bf16.mxu1 %v1628_v4  ;;  %v1726_v29 = vpack.c.bf16 %v58_v28, %v57_v27  ;;  %v307_v30 = vld [vmem:[%s1950_s1] sm:$0x3]  ;;  %v30_v35 = vld [vmem:[%s1948_s2 + $0x90] sm:$0xff] }
   0xa   :  { %1457 = vmatprep.subr.bf16.mxu0 %v1456_v19  ;;  %v390_v31 = vrot.slane %v307_v30, 1  ;;  %v29_v33 = vld [vmem:[%s1948_s2 + $0x80] sm:$0xff]  ;;  %v32_v39 = vld [vmem:[%s1948_s2 + $0xb0] sm:$0xff] }
   0xb   :  { %v1465_v34 = vpack.c.bf16 %v29_v33, %v28_v32  ;;  %v31_v36 = vld [vmem:[%s1948_s2 + $0xa0] sm:$0xff]  ;;  %v34_v42 = vld [vmem:[%s1948_s2 + $0xd0] sm:$0xff] }
   0xc   :  { %391 = vrot.lane.b32.xlu1 %v390_v31, %s1632_s25  ;;  %v1468_v38 = vpack.c.bf16 %v31_v36, %v30_v35  ;;  %v33_v40 = vld [vmem:[%s1948_s2 + $0xc0] sm:$0xff]  ;;  %v36_v45 = vld [vmem:[%s1948_s2 + $0xf0] sm:$0xff] }
   0xd   :  { %1459 = vmatpush1.bf16.msra.mxu0 %v1458_v23  ;;  %v1471_v41 = vpack.c.bf16 %v33_v40, %v32_v39  ;;  %v35_v43 = vld [vmem:[%s1948_s2 + $0xe0] sm:$0xff]  ;;  %v38_v48 = vld [vmem:[%s1948_s2 + $0x110] sm:$0xff] }
   0xe   :  { %1500 = vmatprep.subr.bf16.mxu0 %v1628_v4  ;;  %v1474_v44 = vpack.c.bf16 %v35_v43, %v34_v42  ;;  %v37_v46 = vld [vmem:[%s1948_s2 + $0x100] sm:$0xff]  ;;  %v40_v51 = vld [vmem:[%s1948_s2 + $0x130] sm:$0xff] }
   0xf   :  { %v1477_v47 = vpack.c.bf16 %v37_v46, %v36_v45  ;;  %v39_v49 = vld [vmem:[%s1948_s2 + $0x120] sm:$0xff]  ;;  %v42_v54 = vld [vmem:[%s1948_s2 + $0x150] sm:$0xff] }
  0x10   :  { %1273 = vmatmul.mubr.msk.f32.vlgmr.msra.gmra.mrb[0].mxu0 %vm76_vm4, %v64_v16  ;;  %v1480_v50 = vpack.c.bf16 %v39_v49, %v38_v48  ;;  %v41_v52 = vld [vmem:[%s1948_s2 + $0x140] sm:$0xff]  ;;  %v44_v57 = vld [vmem:[%s1948_s2 + $0x170] sm:$0xff] }
  0x11   :  { %1357 = vmatprep.mubr.msk.f32.mxu0 %vm1629_vm0, %v1627_v3  ;;  %1502 = vmatpush3.bf16.msra.mxu0 %v1716_v26  ;;  %v1483_v53 = vpack.c.bf16 %v41_v52, %v40_v51  ;;  %v43_v55 = vld [vmem:[%s1948_s2 + $0x160] sm:$0xff]  ;;  %v46_v60 = vld [vmem:[%s1948_s2 + $0x190] sm:$0xff] }
  0x12   :  { %1503 = vmatprep.subr.bf16.mxu0 %v1628_v4  ;;  %v1486_v56 = vpack.c.bf16 %v43_v55, %v42_v54  ;;  %v45_v58 = vld [vmem:[%s1948_s2 + $0x180] sm:$0xff]  ;;  %v48_v63 = vld [vmem:[%s1948_s2 + $0x1b0] sm:$0xff] }
  0x13   :  { %v1489_v59 = vpack.c.bf16 %v45_v58, %v44_v57  ;;  %v47_v61 = vld [vmem:[%s1948_s2 + $0x1a0] sm:$0xff]  ;;  %v50_v2 = vld [vmem:[%s1948_s2 + $0x1d0] sm:$0xff] }
  0x14   :  { %v1492_v62 = vpack.c.bf16 %v47_v61, %v46_v60  ;;  %v49_v0 = vld [vmem:[%s1948_s2 + $0x1c0] sm:$0xff]  ;;  %v54_v24 = vld [vmem:[%s1948_s2 + $0x210] ss:$0 sm:$0xff] }
  0x15   :  { %1505 = vmatpush3.bf16.msra.mxu0 %v1726_v29  ;;  %v1495_v1 = vpack.c.bf16 %v49_v0, %v48_v63  ;;  %v51_v5 = vld [vmem:[%s1948_s2 + $0x1e0] sm:$0xff] }
  0x16   :  { %1506 = vmatprep.subr.bf16.mxu0 %v1628_v4  ;;  %v1498_v6 = vpack.c.bf16 %v51_v5, %v50_v2  ;;  %v1272_v10 = vld [vmem:[%s1948_s2 + $0x60] ss:$8 sm:$0x3] }
  0x17   :  { %v69_v12 = vrot.slane %v1272_v10, %v68_v9  ;;  %v73_v13 = vrot.slane %v1272_v10, %v72_v11 }
  0x18   :  { %1358 = vmatmul.mubr.msk.f32.vlgmr.msra.gmra.mrb[2].mxu0 %vm308_vm5, %v307_v30 }
  0x19   :  { %1508 = vmatpush3.bf16.msra.mxu0 %v1716_v26  ;;  %1368 = vmatprep.mubr.msk.f32.mxu0 %vm1629_vm0, %v1627_v3 }
  0x1a   :  { %1509 = vmatprep.subr.bf16.mxu0 %v1628_v4 }
  0x1d   :  { %1511 = vmatpush3.bf16.msra.mxu0 %v1726_v29 }
  0x1e   :  { %1512 = vmatprep.subr.bf16.mxu0 %v1628_v4 }
  0x77   :  { %v154_v37 = vpop.permute.xlu0 %153 }
  0x78   :  { %1347 = vmatmul.mubr.msk.f32.vlgmr.msra.gmra.mrb[0].mxu1 %vm155_vm6, %v154_v37 }
  0x79   :  { %1466 = vmatpush1.bf16.msra.mxu1 %v1465_v34 }
  0x7a   :  { %1467 = vmatprep.subr.bf16.mxu1 %v1628_v4 }
  0x7d   :  { %1469 = vmatpush1.bf16.msra.mxu1 %v1468_v38 }
  0x7e   :  { %1470 = vmatprep.subr.bf16.mxu1 %v1628_v4  ;;  %v392_v39 = vpop.permute.xlu1 %391 }
  0x81   :  { %1472 = vmatpush1.bf16.msra.mxu1 %v1471_v41 }
  0x82   :  { %1473 = vmatprep.subr.bf16.mxu1 %v1628_v4 }
  0x85   :  { %1475 = vmatpush1.bf16.msra.mxu1 %v1474_v44 }
  0x86   :  { %1476 = vmatprep.subr.bf16.mxu1 %v1628_v4 }
  0x89   :  { %1478 = vmatpush1.bf16.msra.mxu1 %v1477_v47 }
  0x8a   :  { %1479 = vmatprep.subr.bf16.mxu1 %v1628_v4 }
  0x8d   :  { %1481 = vmatpush1.bf16.msra.mxu1 %v1480_v50 }
  0x8e   :  { %1482 = vmatprep.subr.bf16.mxu1 %v1628_v4 }
  0x91   :  { %1484 = vmatpush1.bf16.msra.mxu1 %v1483_v53 }
  0x92   :  { %1485 = vmatprep.subr.bf16.mxu1 %v1628_v4 }
  0x95   :  { %1487 = vmatpush1.bf16.msra.mxu1 %v1486_v56 }
  0x96   :  { %1488 = vmatprep.subr.bf16.mxu1 %v1628_v4 }
  0x99   :  { %1490 = vmatpush1.bf16.msra.mxu1 %v1489_v59 }
  0x9a   :  { %1491 = vmatprep.subr.bf16.mxu1 %v1628_v4 }
  0x9d   :  { %1493 = vmatpush1.bf16.msra.mxu1 %v1492_v62 }
  0x9e   :  { %1494 = vmatprep.subr.bf16.mxu1 %v1628_v4 }
  0xa1   :  { %1496 = vmatpush1.bf16.msra.mxu1 %v1495_v1 }
  0xa2   :  { %1497 = vmatprep.subr.bf16.mxu1 %v1628_v4 }
  0xa5   :  { %1499 = vmatpush1.bf16.msra.mxu1 %v1498_v6 }
  0xa6   :  { %1536 = vmatprep.subr.bf16.mxu1 %v1628_v4 }
  0xe3   :  { %v146_v14 = vpop.f32.mrb[0].mxu0 }
  0xe4   :  { %v147_v15 = vadd.f32 %v146_v14, %v69_v12  ;;  %v148_v16 = vpop.f32.mrb[1].mxu0 }
  0xe5   :  { %v149_v17 = vadd.f32 %v148_v16, %v73_v13 }
  0xe6   :  { %v151_v19 = vmax.f32 %v147_v15, 0.0 }
  0xe7   :  { %v152_v18 = vmax.f32 %v149_v17, 0.0 }
  0xe9   :  { %1276 = vmatprep.mubr.msk.f32.mxu1 %vm232_vm7, %v152_v18 }
  0xea   :  { %301 = vmatmul.mubr.f32.vlgmr.msra.gmra.mrb[2].mxu1 %v151_v19 }
  0xeb   :  { %1538 = vmatpush3.bf16.msra.mxu1 %v1716_v26  ;;  %1423 = vmatprep.mubr.msk.f32.mxu1 %vm1629_vm0, %v1627_v3  ;;  %v378_v20 = vpop.f32.mrb[2].mxu0 }
  0xec   :  { %1539 = vmatprep.subr.bf16.mxu1 %v1628_v4  ;;  %v1359_v21 = vpop.f32.mrb[3].mxu0 }
  0xef   :  { %1541 = vmatpush3.bf16.msra.mxu1 %v1726_v29 }
  0xf0   :  { %1548 = vmatprep.subr.bf16.mxu1 %v1628_v4 }
 0x14b   :  { %v228_v22 = vpop.f32.mrb[0].mxu1 }
 0x14c   :  { %v1348_v23 = vpop.f32.mrb[1].mxu1 }
 0x1bd   :  { %v302_v25 = vpop.f32.mrb[2].mxu1 }
 0x1be   :  { %v303_v27 = vadd.f32 %v302_v25, %v228_v22  ;;  %v304_v28 = vpop.f32.mrb[3].mxu1 }
 0x1c0   :  { %v1837_v30 = vadd.f32 %v303_v27, %v54_v24 }
 0x1c2   :  { %v382_v31 = vadd.f32 %v378_v20, %v1837_v30 }
 0x1c4   :  { %1563 = vtanh.f32 %v382_v31  ;;  %v1278_v33 = vmul.f32 -1.442695, %v382_v31 }
 0x1c6   :  { %1565 = vpow2.f32 %v1278_v33 }
 0x1ce   :  { %v1564_v32 = vpop.eup %1563 }
 0x1cf   :  { %396 = vrot.lane.b32.xlu0 %v1564_v32, %s1633_s21 }
 0x1d0   :  { %v1566_v34 = vpop.eup %1565 }
 0x1d1   :  { %v386_v35 = vadd.f32 1.0, %v1566_v34 }
 0x1d3   :  { %1567 = vrcp.f32 %v386_v35 }
 0x1dd   :  { %v1568_v36 = vpop.eup %1567 }
 0x1de   :  { %v394_v40 = vmul.f32 %v1568_v36, %v392_v39 }
 0x241   :  { %v397_v37 = vpop.permute.xlu0 %396 }
 0x242   :  { %v399_v38 = vmul.f32 %v1568_v36, %v397_v37 }
 0x244   :  { %401 = vrot.lane.b32.xlu1 %v399_v38, %s1632_s25 }
 0x2b6   :  { %v402_v41 = vpop.permute.xlu1 %401 }
 0x2b7   :  { %v1842_v42 = vadd.f32 %v402_v41, %v394_v40 }
 0x2b9   :  { %1569 = vtanh.f32 %v1842_v42  ;;  %v498_v58 = vrot.slane %v1842_v42, 7 }
 0x2c3   :  { %v1570_v43 = vpop.eup %1569 }
 0x2c4   :  { %407 = vrot.lane.b32.xlu0 %v1570_v43, %s1633_s21 }
 0x336   :  { %v408_v44 = vpop.permute.xlu0 %407 }
 0x337   :  { %v1846_v45 = vmul.f32 %v1568_v36, %v408_v44 }
 0x339   :  { %412 = vrot.lane.b32.xlu1 %v1846_v45, %s1632_s25 }
 0x3ab   :  { %v413_v46 = vpop.permute.xlu1 %412 }
 0x3ac   :  { %1369 = vmatmul.mubr.msk.f32.vlgmr.msra.gmra.mrb[4].mxu0 %vm308_vm5, %v413_v46 }
 0x3ad   :  { %1514 = vmatpush3.bf16.msra.mxu0 %v1716_v26  ;;  %1379 = vmatprep.mubr.msk.f32.mxu0 %vm1629_vm0, %v1627_v3 }
 0x3ae   :  { %1515 = vmatprep.subr.bf16.mxu0 %v1628_v4 }
 0x3b1   :  { %1517 = vmatpush3.bf16.msra.mxu0 %v1726_v29 }
 0x3b2   :  { %1518 = vmatprep.subr.bf16.mxu0 %v1628_v4 }
 0x47f   :  { %v482_v47 = vpop.f32.mrb[4].mxu0 }
 0x480   :  { %v487_v48 = vrot.slane %v482_v47, 7  ;;  %v1370_v49 = vpop.f32.mrb[5].mxu0 }
 0x482   :  { %v489_v50 = vadd.f32 %v487_v48, %v1837_v30 }
 0x484   :  { %1571 = vtanh.f32 %v489_v50  ;;  %v1280_v52 = vmul.f32 -1.442695, %v489_v50 }
 0x486   :  { %1573 = vpow2.f32 %v1280_v52 }
 0x48e   :  { %v1572_v51 = vpop.eup %1571 }
 0x48f   :  { %502 = vrot.lane.b32.xlu0 %v1572_v51, %s1633_s21 }
 0x490   :  { %v1574_v53 = vpop.eup %1573 }
 0x491   :  { %v493_v54 = vadd.f32 1.0, %v1574_v53 }
 0x493   :  { %1575 = vrcp.f32 %v493_v54 }
 0x49d   :  { %v1576_v55 = vpop.eup %1575 }
 0x49e   :  { %v500_v59 = vmul.f32 %v1576_v55, %v498_v58 }
 0x501   :  { %v503_v56 = vpop.permute.xlu0 %502 }
 0x502   :  { %v505_v57 = vmul.f32 %v1576_v55, %v503_v56 }
 0x504   :  { %507 = vrot.lane.b32.xlu1 %v505_v57, %s1632_s25 }
 0x576   :  { %v508_v60 = vpop.permute.xlu1 %507 }
 0x577   :  { %v510_v61 = vadd.f32 %v508_v60, %v500_v59 }
 0x579   :  { %1577 = vtanh.f32 %v510_v61  ;;  %v605_v16 = vrot.slane %v510_v61, 7  ;;  %v1172_v20 = vsel %vm1159_vm8, %v1842_v42, %v510_v61 }
 0x583   :  { %v1578_v62 = vpop.eup %1577 }
 0x584   :  { %513 = vrot.lane.b32.xlu0 %v1578_v62, %s1633_s21 }
 0x5f6   :  { %v514_v63 = vpop.permute.xlu0 %513 }
 0x5f7   :  { %v516_v0 = vmul.f32 %v1576_v55, %v514_v63 }
 0x5f9   :  { %v518_v1 = vrot.slane %v516_v0, 1  ;;  %v1160_v25 = vsel %vm1159_vm8, %v1846_v45, %v516_v0 }
 0x5fb   :  { %519 = vrot.lane.b32.xlu1 %v518_v1, %s1632_s25 }
 0x66d   :  { %v520_v2 = vpop.permute.xlu1 %519 }
 0x66e   :  { %1380 = vmatmul.mubr.msk.f32.vlgmr.msra.gmra.mrb[6].mxu0 %vm308_vm5, %v520_v2 }
 0x66f   :  { %1520 = vmatpush3.bf16.msra.mxu0 %v1716_v26  ;;  %1390 = vmatprep.mubr.msk.f32.mxu0 %vm1629_vm0, %v1627_v3 }
 0x670   :  { %1521 = vmatprep.subr.bf16.mxu0 %v1628_v4 }
 0x673   :  { %1523 = vmatpush3.bf16.msra.mxu0 %v1726_v29 }
 0x674   :  { %1524 = vmatprep.subr.bf16.mxu0 %v1628_v4 }
 0x741   :  { %v589_v5 = vpop.f32.mrb[6].mxu0 }
 0x742   :  { %v594_v6 = vrot.slane %v589_v5, 6  ;;  %v1381_v7 = vpop.f32.mrb[7].mxu0 }
 0x744   :  { %v596_v8 = vadd.f32 %v594_v6, %v1837_v30 }
 0x746   :  { %1579 = vtanh.f32 %v596_v8  ;;  %v1282_v10 = vmul.f32 -1.442695, %v596_v8 }
 0x748   :  { %1581 = vpow2.f32 %v1282_v10 }
 0x750   :  { %v1580_v9 = vpop.eup %1579 }
 0x751   :  { %609 = vrot.lane.b32.xlu0 %v1580_v9, %s1633_s21 }
 0x752   :  { %v1582_v11 = vpop.eup %1581 }
 0x753   :  { %v600_v12 = vadd.f32 1.0, %v1582_v11 }
 0x755   :  { %1583 = vrcp.f32 %v600_v12 }
 0x75f   :  { %v1584_v13 = vpop.eup %1583 }
 0x760   :  { %v607_v17 = vmul.f32 %v1584_v13, %v605_v16 }
 0x7c3   :  { %v610_v14 = vpop.permute.xlu0 %609 }
 0x7c4   :  { %v612_v15 = vmul.f32 %v1584_v13, %v610_v14 }
 0x7c6   :  { %614 = vrot.lane.b32.xlu1 %v612_v15, %s1632_s25 }
 0x838   :  { %v615_v18 = vpop.permute.xlu1 %614 }
 0x839   :  { %v617_v19 = vadd.f32 %v615_v18, %v607_v17 }
 0x83b   :  { %1585 = vtanh.f32 %v617_v19  ;;  %v1173_v21 = vsel %vm1161_vm9, %v1172_v20, %v617_v19  ;;  %v712_v43 = vrot.slane %v617_v19, 7 }
 0x845   :  { %v1586_v22 = vpop.eup %1585 }
 0x846   :  { %620 = vrot.lane.b32.xlu0 %v1586_v22, %s1633_s21 }
 0x8b8   :  { %v621_v23 = vpop.permute.xlu0 %620 }
 0x8b9   :  { %v623_v24 = vmul.f32 %v1584_v13, %v621_v23 }
 0x8bb   :  { %v625_v27 = vrot.slane %v623_v24, 2  ;;  %v1162_v28 = vsel %vm1161_vm9, %v1160_v25, %v623_v24 }
 0x8bd   :  { %626 = vrot.lane.b32.xlu1 %v625_v27, %s1632_s25 }
 0x92f   :  { %v627_v31 = vpop.permute.xlu1 %626 }
 0x930   :  { %1391 = vmatmul.mubr.msk.f32.vlgmr.msra.gmra.mrb[8].mxu0 %vm308_vm5, %v627_v31 }
 0x931   :  { %1526 = vmatpush3.bf16.msra.mxu0 %v1716_v26  ;;  %1401 = vmatprep.mubr.msk.f32.mxu0 %vm1629_vm0, %v1627_v3 }
 0x932   :  { %1527 = vmatprep.subr.bf16.mxu0 %v1628_v4 }
 0x935   :  { %1529 = vmatpush3.bf16.msra.mxu0 %v1726_v29 }
 0x936   :  { %1530 = vmatprep.subr.bf16.mxu0 %v1628_v4 }
 0xa03   :  { %v696_v32 = vpop.f32.mrb[8].mxu0 }
 0xa04   :  { %v701_v33 = vrot.slane %v696_v32, 5  ;;  %v1392_v34 = vpop.f32.mrb[9].mxu0 }
 0xa06   :  { %v703_v35 = vadd.f32 %v701_v33, %v1837_v30 }
 0xa08   :  { %1587 = vtanh.f32 %v703_v35  ;;  %v1284_v37 = vmul.f32 -1.442695, %v703_v35 }
 0xa0a   :  { %1589 = vpow2.f32 %v1284_v37 }
 0xa12   :  { %v1588_v36 = vpop.eup %1587 }
 0xa13   :  { %716 = vrot.lane.b32.xlu0 %v1588_v36, %s1633_s21 }
 0xa14   :  { %v1590_v38 = vpop.eup %1589 }
 0xa15   :  { %v707_v39 = vadd.f32 1.0, %v1590_v38 }
 0xa17   :  { %1591 = vrcp.f32 %v707_v39 }
 0xa21   :  { %v1592_v40 = vpop.eup %1591 }
 0xa22   :  { %v714_v44 = vmul.f32 %v1592_v40, %v712_v43 }
 0xa85   :  { %v717_v41 = vpop.permute.xlu0 %716 }
 0xa86   :  { %v719_v42 = vmul.f32 %v1592_v40, %v717_v41 }
 0xa88   :  { %721 = vrot.lane.b32.xlu1 %v719_v42, %s1632_s25 }
 0xafa   :  { %v722_v45 = vpop.permute.xlu1 %721 }
 0xafb   :  { %v724_v46 = vadd.f32 %v722_v45, %v714_v44 }
 0xafd   :  { %1593 = vtanh.f32 %v724_v46  ;;  %v1174_v47 = vsel %vm1163_vm10, %v1173_v21, %v724_v46  ;;  %v819_v1 = vrot.slane %v724_v46, 7 }
 0xb07   :  { %v1594_v48 = vpop.eup %1593 }
 0xb08   :  { %727 = vrot.lane.b32.xlu0 %v1594_v48, %s1633_s21 }
 0xb7a   :  { %v728_v49 = vpop.permute.xlu0 %727 }
 0xb7b   :  { %v730_v50 = vmul.f32 %v1592_v40, %v728_v49 }
 0xb7d   :  { %v732_v51 = vrot.slane %v730_v50, 3  ;;  %v1164_v52 = vsel %vm1163_vm10, %v1162_v28, %v730_v50 }
 0xb7f   :  { %733 = vrot.lane.b32.xlu1 %v732_v51, %s1632_s25 }
 0xbf1   :  { %v734_v53 = vpop.permute.xlu1 %733 }
 0xbf2   :  { %1402 = vmatmul.mubr.msk.f32.vlgmr.msra.gmra.mrb[10].mxu0 %vm308_vm5, %v734_v53 }
 0xbf3   :  { %1532 = vmatpush3.bf16.msra.mxu0 %v1716_v26  ;;  %1412 = vmatprep.mubr.msk.f32.mxu0 %vm1629_vm0, %v1627_v3 }
 0xbf4   :  { %1533 = vmatprep.subr.bf16.mxu0 %v1628_v4 }
 0xbf7   :  { %1535 = vmatpush3.bf16.msra.mxu0 %v1726_v29 }
 0xbf8   :  { %1542 = vmatprep.subr.bf16.mxu0 %v1628_v4 }
 0xcc5   :  { %v803_v54 = vpop.f32.mrb[10].mxu0 }
 0xcc6   :  { %v808_v55 = vrot.slane %v803_v54, 4  ;;  %v1403_v56 = vpop.f32.mrb[11].mxu0 }
 0xcc8   :  { %v810_v57 = vadd.f32 %v808_v55, %v1837_v30 }
 0xcca   :  { %1595 = vtanh.f32 %v810_v57  ;;  %v1286_v59 = vmul.f32 -1.442695, %v810_v57 }
 0xccc   :  { %1597 = vpow2.f32 %v1286_v59 }
 0xcd4   :  { %v1596_v58 = vpop.eup %1595 }
 0xcd5   :  { %823 = vrot.lane.b32.xlu0 %v1596_v58, %s1633_s21 }
 0xcd6   :  { %v1598_v60 = vpop.eup %1597 }
 0xcd7   :  { %v814_v61 = vadd.f32 1.0, %v1598_v60 }
 0xcd9   :  { %1599 = vrcp.f32 %v814_v61 }
 0xce3   :  { %v1600_v62 = vpop.eup %1599 }
 0xce4   :  { %v821_v2 = vmul.f32 %v1600_v62, %v819_v1 }
 0xd47   :  { %v824_v63 = vpop.permute.xlu0 %823 }
 0xd48   :  { %v826_v0 = vmul.f32 %v1600_v62, %v824_v63 }
 0xd4a   :  { %828 = vrot.lane.b32.xlu1 %v826_v0, %s1632_s25 }
 0xdbc   :  { %v829_v5 = vpop.permute.xlu1 %828 }
 0xdbd   :  { %v831_v6 = vadd.f32 %v829_v5, %v821_v2 }
 0xdbf   :  { %1601 = vtanh.f32 %v831_v6  ;;  %v1175_v7 = vsel %vm1165_vm11, %v1174_v47, %v831_v6 }
 0xdc9   :  { %v1602_v8 = vpop.eup %1601 }
 0xdca   :  { %834 = vrot.lane.b32.xlu0 %v1602_v8, %s1633_s21 }
 0xe3c   :  { %v835_v9 = vpop.permute.xlu0 %834 }
 0xe3d   :  { %v837_v10 = vmul.f32 %v1600_v62, %v835_v9 }
 0xe3f   :  { %v839_v11 = vrot.slane %v837_v10, 4  ;;  %v1166_v12 = vsel %vm1165_vm11, %v1164_v52, %v837_v10 }
 0xe41   :  { %840 = vrot.lane.b32.xlu1 %v839_v11, %s1632_s25  ;;  %v59_v11 = vld [vmem:[%s1948_s2 + $0x260] sm:$0xff] }
 0xeb3   :  { %v841_v13 = vpop.permute.xlu1 %840 }
 0xeb4   :  { %1413 = vmatmul.mubr.msk.f32.vlgmr.msra.gmra.mrb[12].mxu0 %vm308_vm5, %v841_v13  ;;  %v61_v13 = vld [vmem:[%s1948_s2 + $0x280] sm:$0xff] }
 0xeb5   :  { %1544 = vmatpush3.bf16.msra.mxu0 %v1716_v26  ;;  %1434 = vmatprep.mubr.msk.f32.mxu0 %vm1629_vm0, %v1627_v3 }
 0xeb6   :  { %1545 = vmatprep.subr.bf16.mxu0 %v1628_v4 }
 0xeb9   :  { %1547 = vmatpush3.bf16.msra.mxu0 %v1726_v29  ;;  %v926_v29 = vrot.slane %v831_v6, 7 }
 0xf87   :  { %v910_v14 = vpop.f32.mrb[12].mxu0 }
 0xf88   :  { %v915_v15 = vrot.slane %v910_v14, 3  ;;  %v1414_v16 = vpop.f32.mrb[13].mxu0 }
 0xf8a   :  { %v917_v17 = vadd.f32 %v915_v15, %v1837_v30  ;;  %v62_v15 = vld [vmem:[%s1948_s2 + $0x290] sm:$0xff] }
 0xf8b   :  { %v1552_v16 = vpack.c.bf16 %v62_v15, %v61_v13 }
 0xf8c   :  { %1603 = vtanh.f32 %v917_v17  ;;  %v1288_v19 = vmul.f32 -1.442695, %v917_v17 }
 0xf8e   :  { %1605 = vpow2.f32 %v1288_v19 }
 0xf96   :  { %v1604_v18 = vpop.eup %1603 }
 0xf97   :  { %930 = vrot.lane.b32.xlu0 %v1604_v18, %s1633_s21 }
 0xf98   :  { %v1606_v20 = vpop.eup %1605 }
 0xf99   :  { %v921_v26 = vadd.f32 1.0, %v1606_v20 }
 0xf9b   :  { %1607 = vrcp.f32 %v921_v26 }
 0xfa5   :  { %v1608_v21 = vpop.eup %1607 }
 0xfa6   :  { %v928_v24 = vmul.f32 %v1608_v21, %v926_v29 }
0x1009   :  { %v931_v22 = vpop.permute.xlu0 %930 }
0x100a   :  { %v933_v23 = vmul.f32 %v1608_v21, %v931_v22 }
0x100c   :  { %935 = vrot.lane.b32.xlu1 %v933_v23, %s1632_s25 }
0x107e   :  { %v936_v25 = vpop.permute.xlu1 %935 }
0x107f   :  { %v938_v27 = vadd.f32 %v936_v25, %v928_v24 }
0x1081   :  { %1609 = vtanh.f32 %v938_v27  ;;  %v1176_v28 = vsel %vm1167_vm12, %v1175_v7, %v938_v27 }
0x108b   :  { %v1610_v31 = vpop.eup %1609 }
0x108c   :  { %941 = vrot.lane.b32.xlu0 %v1610_v31, %s1633_s21 }
0x10fe   :  { %v942_v32 = vpop.permute.xlu0 %941 }
0x10ff   :  { %v944_v33 = vmul.f32 %v1608_v21, %v942_v32 }
0x1101   :  { %v946_v34 = vrot.slane %v944_v33, 5  ;;  %v1168_v35 = vsel %vm1167_vm12, %v1166_v12, %v944_v33  ;;  %v60_v12 = vld [vmem:[%s1948_s2 + $0x270] sm:$0xff] }
0x1102   :  { %v1549_v14 = vpack.c.bf16 %v60_v12, %v59_v11 }
0x1103   :  { %947 = vrot.lane.b32.xlu1 %v946_v34, %s1632_s25 }
0x1175   :  { %v948_v36 = vpop.permute.xlu1 %947 }
0x1176   :  { %1424 = vmatmul.mubr.msk.f32.vlgmr.msra.gmra.mrb[4].mxu1 %vm308_vm5, %v948_v36 }
0x1177   :  { %1445 = vmatprep.mubr.msk.f32.mxu1 %vm1629_vm0, %v1627_v3  ;;  %v1033_v3 = vrot.slane %v938_v27, 7  ;;  %1550 = vmatpush3.bf16.msra.mxu1 %v1549_v14  ;;  %vm1265_vm0 = vcmask 637952  }
0x1178   :  { %1551 = vmatprep.subr.bf16.mxu1 %v1628_v4  ;;  %v63_v4 = vld [vmem:[%s1948_s2 + $0x2a0] ss:$0 sm:$0xff] }
0x117b   :  { %1553 = vmatpush3.bf16.msra.mxu1 %v1552_v16 }
0x1249   :  { %v1017_v37 = vpop.f32.mrb[4].mxu1 }
0x124a   :  { %v1022_v38 = vrot.slane %v1017_v37, 2  ;;  %v1425_v39 = vpop.f32.mrb[5].mxu1 }
0x124c   :  { %v1024_v40 = vadd.f32 %v1022_v38, %v1837_v30 }
0x124e   :  { %1611 = vtanh.f32 %v1024_v40  ;;  %v1290_v42 = vmul.f32 -1.442695, %v1024_v40 }
0x1250   :  { %1613 = vpow2.f32 %v1290_v42 }
0x1258   :  { %v1612_v41 = vpop.eup %1611 }
0x1259   :  { %1037 = vrot.lane.b32.xlu0 %v1612_v41, %s1633_s21 }
0x125a   :  { %v1614_v43 = vpop.eup %1613 }
0x125b   :  { %v1028_v44 = vadd.f32 1.0, %v1614_v43 }
0x125d   :  { %1615 = vrcp.f32 %v1028_v44 }
0x1267   :  { %v1616_v45 = vpop.eup %1615 }
0x1268   :  { %v1035_v48 = vmul.f32 %v1616_v45, %v1033_v3 }
0x12cb   :  { %v1038_v46 = vpop.permute.xlu0 %1037 }
0x12cc   :  { %v1040_v47 = vmul.f32 %v1616_v45, %v1038_v46 }
0x12ce   :  { %1042 = vrot.lane.b32.xlu1 %v1040_v47, %s1632_s25 }
0x1340   :  { %v1043_v49 = vpop.permute.xlu1 %1042 }
0x1341   :  { %v1045_v50 = vadd.f32 %v1043_v49, %v1035_v48 }
0x1343   :  { %1617 = vtanh.f32 %v1045_v50  ;;  %v1177_v51 = vsel %vm1169_vm13, %v1176_v28, %v1045_v50  ;;  %v1140_v7 = vrot.slane %v1045_v50, 7 }
0x134d   :  { %v1618_v52 = vpop.eup %1617 }
0x134e   :  { %1048 = vrot.lane.b32.xlu0 %v1618_v52, %s1633_s21 }
0x13c0   :  { %v1049_v53 = vpop.permute.xlu0 %1048 }
0x13c1   :  { %v1051_v54 = vmul.f32 %v1616_v45, %v1049_v53 }
0x13c3   :  { %v1053_v55 = vrot.slane %v1051_v54, 6  ;;  %v1170_v56 = vsel %vm1169_vm13, %v1168_v35, %v1051_v54 }
0x13c5   :  { %1054 = vrot.lane.b32.xlu1 %v1053_v55, %s1632_s25 }
0x1437   :  { %v1055_v57 = vpop.permute.xlu1 %1054 }
0x1438   :  { %1435 = vmatmul.mubr.msk.f32.vlgmr.msra.gmra.mrb[14].mxu0 %vm308_vm5, %v1055_v57 }
0x150b   :  { %v1124_v58 = vpop.f32.mrb[14].mxu0 }
0x150c   :  { %v1129_v59 = vrot.slane %v1124_v58, 1  ;;  %v1436_v60 = vpop.f32.mrb[15].mxu0 }
0x150e   :  { %v1131_v61 = vadd.f32 %v1129_v59, %v1837_v30 }
0x1510   :  { %1619 = vtanh.f32 %v1131_v61  ;;  %v1292_v63 = vmul.f32 -1.442695, %v1131_v61 }
0x1512   :  { %1621 = vpow2.f32 %v1292_v63 }
0x151a   :  { %v1620_v62 = vpop.eup %1619 }
0x151b   :  { %1144 = vrot.lane.b32.xlu0 %v1620_v62, %s1633_s21 }
0x151c   :  { %v1622_v0 = vpop.eup %1621 }
0x151d   :  { %v1135_v1 = vadd.f32 1.0, %v1622_v0 }
0x151f   :  { %1623 = vrcp.f32 %v1135_v1 }
0x1529   :  { %v1624_v2 = vpop.eup %1623 }
0x152a   :  { %v1142_v8 = vmul.f32 %v1624_v2, %v1140_v7 }
0x158d   :  { %v1145_v5 = vpop.permute.xlu0 %1144 }
0x158e   :  { %v1147_v6 = vmul.f32 %v1624_v2, %v1145_v5 }
0x1590   :  { %1149 = vrot.lane.b32.xlu1 %v1147_v6, %s1632_s25 }
0x1602   :  { %v1150_v9 = vpop.permute.xlu1 %1149 }
0x1603   :  { %v1152_v10 = vadd.f32 %v1150_v9, %v1142_v8 }
0x1605   :  { %1625 = vtanh.f32 %v1152_v10  ;;  %v1178_v30 = vsel %vm158_vm1, %v1177_v51, %v1152_v10 }
0x160f   :  { %v1626_v17 = vpop.eup %1625 }
0x1610   :  { %1155 = vrot.lane.b32.xlu0 %v1626_v17, %s1633_s21 }
0x1682   :  { %v1156_v18 = vpop.permute.xlu0 %1155 }
0x1683   :  { %v1158_v19 = vmul.f32 %v1624_v2, %v1156_v18 }
0x1685   :  { %v1171_v20 = vsel %vm158_vm1, %v1170_v56, %v1158_v19 }
0x1686   :  { %1254 = vrot.lane.b32.xlu0 %v1171_v20, %s1634_s30  ;;  %1180 = vrot.lane.b32.xlu1 %v1171_v20, %s1632_s25 }
0x168a   :  { %1258 = vrot.lane.b32.xlu1 %v1178_v30, %s1635_s4 }
0x16f8   :  { %v1181_v26 = vpop.permute.xlu1 %1180  ;;  %v1255_v29 = vpop.permute.xlu0 %1254 }
0x16f9   :  { %1446 = vmatmul.mubr.msk.f32.vlgmr.msra.gmra.mrb[6].mxu1 %vm308_vm5, %v1181_v26 }
0x16fc   :  { %v1259_v24 = vpop.permute.xlu1 %1258 }
0x17cc   :  { %v1250_v21 = vpop.f32.mrb[6].mxu1 }
0x17cd   :  { %v1251_v22 = vadd.f32 %v1250_v21, %v63_v4  ;;  %v1447_v23 = vpop.f32.mrb[7].mxu1 }
0x17cf   :  { %v1262_v25 = vsel %vm1261_vm14, %v1251_v22, %v1255_v29 }
0x17d0   :  { %v1264_v27 = vsel %vm1263_vm15, %v1262_v25, %v1259_v24 }
0x17d1   :  { %v1266_v28 = vsel %vm1265_vm0, %v1264_v27, 0.0 }
0x17d2   :  { %1267 = vst [vmem:[%s1951_s3] sm:$0xff] %v1266_v28 }

</bundles_post_ra>
